<compile_context>
chip_gen: v7x
topology: tpu7x:2x2x1
jax: 0.10.0
libtpu: 0.0.40
codegen_flags: <defaults>
</compile_context>

<pallas_src>
import functools

import jax
import jax.numpy as jnp
from jax.experimental import pallas as pl
from jax.experimental.pallas import tpu as pltpu

STATE_SIZE = 8     # state_size
HIDDEN = 32        # hidden_size
NUM_LAYERS = 6     # num_layers (hidden Linear+ReLU blocks)
BATCH = 8          # small demo batch


def value_kernel(x_ref, w_in_ref, b_in_ref, w_hid_ref, b_hid_ref,
                 w_out_ref, b_out_ref, o_ref):
    cdt = w_in_ref.dtype  # MXU input dtype (bf16 by default); accumulation is f32.

    # Input layer: block-diag Linear + ReLU (MXU, f32 accumulate; bias/ReLU f32).
    h = jnp.dot(x_ref[...].astype(cdt), w_in_ref[...],
                preferred_element_type=jnp.float32) + b_in_ref[...]
    h = jnp.maximum(h, 0.0)

    # Hidden stack: NUM_LAYERS x (block-diag Linear + ReLU). Static unroll (tiny
    # trip count); weights stay VMEM-resident, biases hoisted to a single load.
    b_hid = b_hid_ref[...]                                # (L, 1, G*H) f32
    for i in range(w_hid_ref.shape[0]):
        h = jnp.dot(h.astype(cdt), w_hid_ref[i],
                    preferred_element_type=jnp.float32) + b_hid[i]
        h = jnp.maximum(h, 0.0)

    # Output head folded into one block-diag (G*H -> G) MXU matmul: the store
    # is a lane-packed [tile, G] slab instead of a width-1 column.
    o = jnp.dot(h.astype(cdt), w_out_ref[...],
                preferred_element_type=jnp.float32) + b_out_ref[...]
    o_ref[...] = o.astype(o_ref.dtype)


def _round_up(n, m):
    return ((n + m - 1) // m) * m


def _device_kind():
    try:
        return jax.devices()[0].device_kind.lower()
    except Exception:
        return ""


def default_group():
    """Lane-packing factor: 128-wide on v5e (128x128 MXU), 256-wide on v6e/v7x."""
    kind = _device_kind()
    return 4 if ("v5e" in kind or "v5 lite" in kind or "v5lite" in kind) else 8


def default_min_grid_steps():
    """v7x has 2 TensorCores sharded over 'parallel' grid axes; v5e/v6e have 1."""
    return 2 if "v7" in _device_kind() else 1


def pack_params(params, *, group, compute_dtype=jnp.bfloat16):
    """Block-diagonal batch-group packing of the Value-MLP weights.

    Weights fed to the MXU are cast to `compute_dtype` (bf16 default); biases
    stay f32 (bias-add / ReLU run on the VPU in f32).
    """
    w_in, b_in, w_hid, b_hid, w_out, b_out = params
    eye = jnp.eye(group, dtype=jnp.float32)
    bd = lambda w: jnp.kron(eye, w)                        # (in,out)->(G*in,G*out)
    w_in_bd = bd(w_in).astype(compute_dtype)               # (G*S, G*H)
    b_in_bd = jnp.tile(b_in, (1, group))                   # (1, G*H)  f32
    w_hid_bd = jax.vmap(bd)(w_hid).astype(compute_dtype)   # (L, G*H, G*H)
    b_hid_bd = jnp.tile(b_hid, (1, 1, group))               # (L, 1, G*H) f32
    w_out_bd = bd(w_out).astype(compute_dtype)              # (G*H, G)
    b_out_bd = jnp.tile(b_out, (1, group))                  # (1, G)    f32
    return w_in_bd, b_in_bd, w_hid_bd, b_hid_bd, w_out_bd, b_out_bd


@functools.partial(jax.jit,
                   static_argnames=("group", "tile_rows", "min_grid_steps"))
def value_forward(x, packed_params, *, group, tile_rows=2048, min_grid_steps=1):
    w_in, b_in, w_hid, b_hid, w_out, b_out = packed_params
    batch, state_size = x.shape
    g_state = group * state_size
    g_hidden = w_in.shape[1]                  # G * HIDDEN
    num_layers = w_hid.shape[0]

    # Pad batch to a multiple of G and pack G samples per lane row.
    pad_batch = _round_up(batch, group)
    if pad_batch != batch:
        x = jnp.concatenate(
            [x, jnp.zeros((pad_batch - batch, state_size), x.dtype)], axis=0)
    rows = pad_batch // group
    x_packed = x.reshape(rows, g_state)

    # Row-tile the packed batch.  Partial last block handled by Pallas (rows are
    # independent; out-of-range output rows are never written back).
    tile = min(tile_rows, rows)
    if min_grid_steps > 1:
        tile = min(tile, pl.cdiv(rows, min_grid_steps))
    if tile < rows:
        tile = min(_round_up(tile, 8), rows)  # block rows must be a multiple of 8
    grid = (pl.cdiv(rows, tile),)

    out_packed = pl.pallas_call(
        value_kernel,
        out_shape=jax.ShapeDtypeStruct((rows, group), jnp.float32),
        grid=grid,
        in_specs=[
            pl.BlockSpec((tile, g_state), lambda i: (i, 0)),
            # Constant index maps: weights/biases DMA'd once, stay VMEM-resident.
            pl.BlockSpec((g_state, g_hidden), lambda i: (0, 0)),
            pl.BlockSpec((1, g_hidden), lambda i: (0, 0)),
            pl.BlockSpec((num_layers, g_hidden, g_hidden), lambda i: (0, 0, 0)),
            pl.BlockSpec((num_layers, 1, g_hidden), lambda i: (0, 0, 0)),
            pl.BlockSpec((g_hidden, group), lambda i: (0, 0)),
            pl.BlockSpec((1, group), lambda i: (0, 0)),
        ],
        out_specs=pl.BlockSpec((tile, group), lambda i: (i, 0)),
        compiler_params=pltpu.CompilerParams(
            dimension_semantics=("parallel",)),
    )(x_packed, w_in, b_in, w_hid, b_hid, w_out, b_out)

    # Unpack: row r, lane k  ->  sample r*G + k; drop padding rows.
    return out_packed.reshape(pad_batch, 1)[:batch]


def init_params(key):
    """Deterministic init mimicking nn.Linear default (uniform +-1/sqrt(fan_in))."""
    def linear(key, fan_in, fan_out):
        kw, kb = jax.random.split(key)
        bound = 1.0 / (fan_in ** 0.5)
        w = jax.random.uniform(kw, (fan_in, fan_out), jnp.float32, -bound, bound)
        b = jax.random.uniform(kb, (1, fan_out), jnp.float32, -bound, bound)
        return w, b

    keys = jax.random.split(key, 2 + NUM_LAYERS)
    w_in, b_in = linear(keys[0], STATE_SIZE, HIDDEN)

    w_hid_list, b_hid_list = [], []
    for l in range(NUM_LAYERS):
        w, b = linear(keys[1 + l], HIDDEN, HIDDEN)
        w_hid_list.append(w)
        b_hid_list.append(b)
    w_hid = jnp.stack(w_hid_list, axis=0)                  # (L, H, H)
    b_hid = jnp.stack(b_hid_list, axis=0)                  # (L, 1, H)

    w_out, b_out = linear(keys[-1], HIDDEN, 1)             # (H, 1), (1, 1)
    return w_in, b_in, w_hid, b_hid, w_out, b_out


def reference_forward(x, params, compute_dtype):
    """Pure-JAX per-sample reference applying the same MXU-input casts."""
    w_in, b_in, w_hid, b_hid, w_out, b_out = params
    h = jnp.dot(x.astype(compute_dtype), w_in.astype(compute_dtype),
                preferred_element_type=jnp.float32) + b_in
    h = jnp.maximum(h, 0.0)
    for i in range(w_hid.shape[0]):
        h = jnp.dot(h.astype(compute_dtype), w_hid[i].astype(compute_dtype),
                    preferred_element_type=jnp.float32) + b_hid[i]
        h = jnp.maximum(h, 0.0)
    return jnp.dot(h.astype(compute_dtype), w_out.astype(compute_dtype),
                   preferred_element_type=jnp.float32) + b_out


if __name__ == "__main__":
    key = jax.random.PRNGKey(0)
    k_params, k_x = jax.random.split(key)
    params = init_params(k_params)

    G = default_group()                 # 4 on v5e, 8 on v6e/v7x
    min_steps = default_min_grid_steps()  # 2 on v7x, else 1

    # 1) Small-batch, default bf16 MXU path.
    x = jax.random.normal(k_x, (BATCH, STATE_SIZE), jnp.float32)
    packed_bf16 = pack_params(params, group=G, compute_dtype=jnp.bfloat16)
    out = jax.block_until_ready(
        value_forward(x, packed_bf16, group=G, min_grid_steps=min_steps))
    ref = reference_forward(x, params, jnp.bfloat16)
    assert out.shape == (BATCH, 1), out.shape
    assert jnp.allclose(out, ref, atol=2e-2, rtol=2e-2), (out, ref)

    # 2) f32 operand path (still runs on the bf16-native MXU via multi-pass
    #    decomposition, so tolerance is loose-ish rather than 1e-6).
    packed_f32 = pack_params(params, group=G, compute_dtype=jnp.float32)
    out_f32 = jax.block_until_ready(
        value_forward(x, packed_f32, group=G, min_grid_steps=min_steps))
    ref_f32 = reference_forward(x, params, jnp.float32)
    assert jnp.allclose(out_f32, ref_f32, atol=2e-3, rtol=2e-3), (out_f32, ref_f32)

    # 3) Multi-step tiled path: batch=300 (not a multiple of G -> wrapper pads),
    #    tile_rows=16 forces a multi-step "parallel" grid + partial last block.
    x_big = jax.random.normal(jax.random.PRNGKey(1), (300, STATE_SIZE), jnp.float32)
    out_big = jax.block_until_ready(
        value_forward(x_big, packed_bf16, group=G, tile_rows=16,
                      min_grid_steps=min_steps))
    ref_big = reference_forward(x_big, params, jnp.bfloat16)
    assert out_big.shape == (300, 1), out_big.shape
    assert jnp.allclose(out_big, ref_big, atol=2e-2, rtol=2e-2)

    print("KERNEL_OK")
</pallas_src>

<mosaic_0001>
module attributes {stable_mosaic.version = 11 : i64} {
  func.func @value_kernel(%arg0: i32, %arg1: memref<1x64xf32, #tpu.memory_space<vmem>>, %arg2: memref<64x256xbf16, #tpu.memory_space<vmem>>, %arg3: memref<1x256xf32, #tpu.memory_space<vmem>>, %arg4: memref<6x256x256xbf16, #tpu.memory_space<vmem>>, %arg5: memref<6x1x256xf32, #tpu.memory_space<vmem>>, %arg6: memref<256x8xbf16, #tpu.memory_space<vmem>>, %arg7: memref<1x8xf32, #tpu.memory_space<vmem>>, %arg8: memref<1x8xf32, #tpu.memory_space<vmem>>) attributes {dimension_semantics = [#tpu.dimension_semantics<parallel>], iteration_bounds = array<i64: 1>, scalar_prefetch = 0 : i64, scratch_operands = 0 : i64, tpu.core_type = #tpu.core_type<tc>, window_params = [{transform_indices = @transform_0, window_bounds = array<i64: 1, 64>}, {pipeline_mode = #tpu.pipeline_mode<synchronous>, transform_indices = @transform_1, window_bounds = array<i64: 64, 256>}, {pipeline_mode = #tpu.pipeline_mode<synchronous>, transform_indices = @transform_2, window_bounds = array<i64: 1, 256>}, {pipeline_mode = #tpu.pipeline_mode<synchronous>, transform_indices = @transform_3, window_bounds = array<i64: 6, 256, 256>}, {pipeline_mode = #tpu.pipeline_mode<synchronous>, transform_indices = @transform_4, window_bounds = array<i64: 6, 1, 256>}, {pipeline_mode = #tpu.pipeline_mode<synchronous>, transform_indices = @transform_5, window_bounds = array<i64: 256, 8>}, {pipeline_mode = #tpu.pipeline_mode<synchronous>, transform_indices = @transform_6, window_bounds = array<i64: 1, 8>}, {transform_indices = @transform_7, window_bounds = array<i64: 1, 8>}]} {
    %c0 = arith.constant 0 : index
    %c0_0 = arith.constant 0 : index
    %0 = vector.load %arg1[%c0, %c0_0] : memref<1x64xf32, #tpu.memory_space<vmem>>, vector<1x64xf32>
    %1 = arith.truncf %0 : vector<1x64xf32> to vector<1x64xbf16>
    %c0_1 = arith.constant 0 : index
    %c0_2 = arith.constant 0 : index
    %2 = vector.load %arg2[%c0_1, %c0_2] : memref<64x256xbf16, #tpu.memory_space<vmem>>, vector<64x256xbf16>
    %cst = arith.constant dense<0.000000e+00> : vector<1x256xf32>
    %3 = tpu.matmul %1, %2, %cst {dimension_numbers = #tpu.dot_dimension_numbers<[1], [0], [0], [1], [0, 0, 1, 1], [], []>} : vector<1x64xbf16>, vector<64x256xbf16>, vector<1x256xf32> -> vector<1x256xf32>
    %c0_3 = arith.constant 0 : index
    %c0_4 = arith.constant 0 : index
    %4 = vector.load %arg3[%c0_3, %c0_4] : memref<1x256xf32, #tpu.memory_space<vmem>>, vector<1x256xf32>
    %5 = arith.addf %3, %4 : vector<1x256xf32>
    %cst_5 = arith.constant 0.000000e+00 : f32
    %6 = vector.broadcast %cst_5 : f32 to vector<1x256xf32>
    %7 = arith.maximumf %5, %6 : vector<1x256xf32>
    %c0_6 = arith.constant 0 : index
    %c0_7 = arith.constant 0 : index
    %c0_8 = arith.constant 0 : index
    %8 = vector.load %arg5[%c0_6, %c0_7, %c0_8] : memref<6x1x256xf32, #tpu.memory_space<vmem>>, vector<6x1x256xf32>
    %9 = arith.truncf %7 : vector<1x256xf32> to vector<1x256xbf16>
    %c0_9 = arith.constant 0 : index
    %c0_10 = arith.constant 0 : index
    %c0_11 = arith.constant 0 : index
    %10 = vector.load %arg4[%c0_9, %c0_10, %c0_11] : memref<6x256x256xbf16, #tpu.memory_space<vmem>>, vector<1x256x256xbf16>
    %11 = vector.shape_cast %10 : vector<1x256x256xbf16> to vector<256x256xbf16>
    %cst_12 = arith.constant dense<0.000000e+00> : vector<1x256xf32>
    %12 = tpu.matmul %9, %11, %cst_12 {dimension_numbers = #tpu.dot_dimension_numbers<[1], [0], [0], [1], [0, 0, 1, 1], [], []>} : vector<1x256xbf16>, vector<256x256xbf16>, vector<1x256xf32> -> vector<1x256xf32>
    %13 = vector.extract_strided_slice %8 {offsets = [0, 0, 0], sizes = [1, 1, 256], strides = [1, 1, 1]} : vector<6x1x256xf32> to vector<1x1x256xf32>
    %14 = vector.shape_cast %13 : vector<1x1x256xf32> to vector<1x256xf32>
    %15 = arith.addf %12, %14 : vector<1x256xf32>
    %cst_13 = arith.constant 0.000000e+00 : f32
    %16 = vector.broadcast %cst_13 : f32 to vector<1x256xf32>
    %17 = arith.maximumf %15, %16 : vector<1x256xf32>
    %18 = arith.truncf %17 : vector<1x256xf32> to vector<1x256xbf16>
    %c1 = arith.constant 1 : index
    %c0_14 = arith.constant 0 : index
    %c0_15 = arith.constant 0 : index
    %19 = vector.load %arg4[%c1, %c0_14, %c0_15] : memref<6x256x256xbf16, #tpu.memory_space<vmem>>, vector<1x256x256xbf16>
    %20 = vector.shape_cast %19 : vector<1x256x256xbf16> to vector<256x256xbf16>
    %cst_16 = arith.constant dense<0.000000e+00> : vector<1x256xf32>
    %21 = tpu.matmul %18, %20, %cst_16 {dimension_numbers = #tpu.dot_dimension_numbers<[1], [0], [0], [1], [0, 0, 1, 1], [], []>} : vector<1x256xbf16>, vector<256x256xbf16>, vector<1x256xf32> -> vector<1x256xf32>
    %22 = vector.extract_strided_slice %8 {offsets = [1, 0, 0], sizes = [1, 1, 256], strides = [1, 1, 1]} : vector<6x1x256xf32> to vector<1x1x256xf32>
    %23 = vector.shape_cast %22 : vector<1x1x256xf32> to vector<1x256xf32>
    %24 = arith.addf %21, %23 : vector<1x256xf32>
    %cst_17 = arith.constant 0.000000e+00 : f32
    %25 = vector.broadcast %cst_17 : f32 to vector<1x256xf32>
    %26 = arith.maximumf %24, %25 : vector<1x256xf32>
    %27 = arith.truncf %26 : vector<1x256xf32> to vector<1x256xbf16>
    %c2 = arith.constant 2 : index
    %c0_18 = arith.constant 0 : index
    %c0_19 = arith.constant 0 : index
    %28 = vector.load %arg4[%c2, %c0_18, %c0_19] : memref<6x256x256xbf16, #tpu.memory_space<vmem>>, vector<1x256x256xbf16>
    %29 = vector.shape_cast %28 : vector<1x256x256xbf16> to vector<256x256xbf16>
    %cst_20 = arith.constant dense<0.000000e+00> : vector<1x256xf32>
    %30 = tpu.matmul %27, %29, %cst_20 {dimension_numbers = #tpu.dot_dimension_numbers<[1], [0], [0], [1], [0, 0, 1, 1], [], []>} : vector<1x256xbf16>, vector<256x256xbf16>, vector<1x256xf32> -> vector<1x256xf32>
    %31 = vector.extract_strided_slice %8 {offsets = [2, 0, 0], sizes = [1, 1, 256], strides = [1, 1, 1]} : vector<6x1x256xf32> to vector<1x1x256xf32>
    %32 = vector.shape_cast %31 : vector<1x1x256xf32> to vector<1x256xf32>
    %33 = arith.addf %30, %32 : vector<1x256xf32>
    %cst_21 = arith.constant 0.000000e+00 : f32
    %34 = vector.broadcast %cst_21 : f32 to vector<1x256xf32>
    %35 = arith.maximumf %33, %34 : vector<1x256xf32>
    %36 = arith.truncf %35 : vector<1x256xf32> to vector<1x256xbf16>
    %c3 = arith.constant 3 : index
    %c0_22 = arith.constant 0 : index
    %c0_23 = arith.constant 0 : index
    %37 = vector.load %arg4[%c3, %c0_22, %c0_23] : memref<6x256x256xbf16, #tpu.memory_space<vmem>>, vector<1x256x256xbf16>
    %38 = vector.shape_cast %37 : vector<1x256x256xbf16> to vector<256x256xbf16>
    %cst_24 = arith.constant dense<0.000000e+00> : vector<1x256xf32>
    %39 = tpu.matmul %36, %38, %cst_24 {dimension_numbers = #tpu.dot_dimension_numbers<[1], [0], [0], [1], [0, 0, 1, 1], [], []>} : vector<1x256xbf16>, vector<256x256xbf16>, vector<1x256xf32> -> vector<1x256xf32>
    %40 = vector.extract_strided_slice %8 {offsets = [3, 0, 0], sizes = [1, 1, 256], strides = [1, 1, 1]} : vector<6x1x256xf32> to vector<1x1x256xf32>
    %41 = vector.shape_cast %40 : vector<1x1x256xf32> to vector<1x256xf32>
    %42 = arith.addf %39, %41 : vector<1x256xf32>
    %cst_25 = arith.constant 0.000000e+00 : f32
    %43 = vector.broadcast %cst_25 : f32 to vector<1x256xf32>
    %44 = arith.maximumf %42, %43 : vector<1x256xf32>
    %45 = arith.truncf %44 : vector<1x256xf32> to vector<1x256xbf16>
    %c4 = arith.constant 4 : index
    %c0_26 = arith.constant 0 : index
    %c0_27 = arith.constant 0 : index
    %46 = vector.load %arg4[%c4, %c0_26, %c0_27] : memref<6x256x256xbf16, #tpu.memory_space<vmem>>, vector<1x256x256xbf16>
    %47 = vector.shape_cast %46 : vector<1x256x256xbf16> to vector<256x256xbf16>
    %cst_28 = arith.constant dense<0.000000e+00> : vector<1x256xf32>
    %48 = tpu.matmul %45, %47, %cst_28 {dimension_numbers = #tpu.dot_dimension_numbers<[1], [0], [0], [1], [0, 0, 1, 1], [], []>} : vector<1x256xbf16>, vector<256x256xbf16>, vector<1x256xf32> -> vector<1x256xf32>
    %49 = vector.extract_strided_slice %8 {offsets = [4, 0, 0], sizes = [1, 1, 256], strides = [1, 1, 1]} : vector<6x1x256xf32> to vector<1x1x256xf32>
    %50 = vector.shape_cast %49 : vector<1x1x256xf32> to vector<1x256xf32>
    %51 = arith.addf %48, %50 : vector<1x256xf32>
    %cst_29 = arith.constant 0.000000e+00 : f32
    %52 = vector.broadcast %cst_29 : f32 to vector<1x256xf32>
    %53 = arith.maximumf %51, %52 : vector<1x256xf32>
    %54 = arith.truncf %53 : vector<1x256xf32> to vector<1x256xbf16>
    %c5 = arith.constant 5 : index
    %c0_30 = arith.constant 0 : index
    %c0_31 = arith.constant 0 : index
    %55 = vector.load %arg4[%c5, %c0_30, %c0_31] : memref<6x256x256xbf16, #tpu.memory_space<vmem>>, vector<1x256x256xbf16>
    %56 = vector.shape_cast %55 : vector<1x256x256xbf16> to vector<256x256xbf16>
    %cst_32 = arith.constant dense<0.000000e+00> : vector<1x256xf32>
    %57 = tpu.matmul %54, %56, %cst_32 {dimension_numbers = #tpu.dot_dimension_numbers<[1], [0], [0], [1], [0, 0, 1, 1], [], []>} : vector<1x256xbf16>, vector<256x256xbf16>, vector<1x256xf32> -> vector<1x256xf32>
    %58 = vector.extract_strided_slice %8 {offsets = [5, 0, 0], sizes = [1, 1, 256], strides = [1, 1, 1]} : vector<6x1x256xf32> to vector<1x1x256xf32>
    %59 = vector.shape_cast %58 : vector<1x1x256xf32> to vector<1x256xf32>
    %60 = arith.addf %57, %59 : vector<1x256xf32>
    %cst_33 = arith.constant 0.000000e+00 : f32
    %61 = vector.broadcast %cst_33 : f32 to vector<1x256xf32>
    %62 = arith.maximumf %60, %61 : vector<1x256xf32>
    %63 = arith.truncf %62 : vector<1x256xf32> to vector<1x256xbf16>
    %c0_34 = arith.constant 0 : index
    %c0_35 = arith.constant 0 : index
    %64 = vector.load %arg6[%c0_34, %c0_35] : memref<256x8xbf16, #tpu.memory_space<vmem>>, vector<256x8xbf16>
    %cst_36 = arith.constant dense<0.000000e+00> : vector<1x8xf32>
    %65 = tpu.matmul %63, %64, %cst_36 {dimension_numbers = #tpu.dot_dimension_numbers<[1], [0], [0], [1], [0, 0, 1, 1], [], []>} : vector<1x256xbf16>, vector<256x8xbf16>, vector<1x8xf32> -> vector<1x8xf32>
    %c0_37 = arith.constant 0 : index
    %c0_38 = arith.constant 0 : index
    %66 = vector.load %arg7[%c0_37, %c0_38] : memref<1x8xf32, #tpu.memory_space<vmem>>, vector<1x8xf32>
    %67 = arith.addf %65, %66 : vector<1x8xf32>
    %c0_39 = arith.constant 0 : index
    %c0_40 = arith.constant 0 : index
    %68 = vector.load %arg8[%c0_39, %c0_40] : memref<1x8xf32, #tpu.memory_space<vmem>>, vector<1x8xf32>
    tpu.vector_store %arg8[%c0_39, %c0_40], %67 {strides = array<i32>} : memref<1x8xf32, #tpu.memory_space<vmem>>, vector<1x8xf32>,
    return
  }
  func.func @transform_0(%arg0: i32) -> (i32, i32) {
    %c0_i32 = arith.constant 0 : i32
    %c0_i32_0 = arith.constant 0 : i32
    return %arg0, %c0_i32 : i32, i32
  }
  func.func @transform_1(%arg0: i32) -> (i32, i32) {
    %c0_i32 = arith.constant 0 : i32
    %c0_i32_0 = arith.constant 0 : i32
    %c0_i32_1 = arith.constant 0 : i32
    return %c0_i32, %c0_i32_0 : i32, i32
  }
  func.func @transform_2(%arg0: i32) -> (i32, i32) {
    %c0_i32 = arith.constant 0 : i32
    %c0_i32_0 = arith.constant 0 : i32
    %c0_i32_1 = arith.constant 0 : i32
    return %c0_i32, %c0_i32_0 : i32, i32
  }
  func.func @transform_3(%arg0: i32) -> (i32, i32, i32) {
    %c0_i32 = arith.constant 0 : i32
    %c0_i32_0 = arith.constant 0 : i32
    %c0_i32_1 = arith.constant 0 : i32
    %c0_i32_2 = arith.constant 0 : i32
    return %c0_i32, %c0_i32_0, %c0_i32_1 : i32, i32, i32
  }
  func.func @transform_4(%arg0: i32) -> (i32, i32, i32) {
    %c0_i32 = arith.constant 0 : i32
    %c0_i32_0 = arith.constant 0 : i32
    %c0_i32_1 = arith.constant 0 : i32
    %c0_i32_2 = arith.constant 0 : i32
    return %c0_i32, %c0_i32_0, %c0_i32_1 : i32, i32, i32
  }
  func.func @transform_5(%arg0: i32) -> (i32, i32) {
    %c0_i32 = arith.constant 0 : i32
    %c0_i32_0 = arith.constant 0 : i32
    %c0_i32_1 = arith.constant 0 : i32
    return %c0_i32, %c0_i32_0 : i32, i32
  }
  func.func @transform_6(%arg0: i32) -> (i32, i32) {
    %c0_i32 = arith.constant 0 : i32
    %c0_i32_0 = arith.constant 0 : i32
    %c0_i32_1 = arith.constant 0 : i32
    return %c0_i32, %c0_i32_0 : i32, i32
  }
  func.func @transform_7(%arg0: i32) -> (i32, i32) {
    %c0_i32 = arith.constant 0 : i32
    %c0_i32_0 = arith.constant 0 : i32
    return %arg0, %c0_i32 : i32, i32
  }
}

</mosaic_0001>

<bundles_post_ra>
// kernel: value_forward.1
= control target key start
LH: loop header
LB: loop body
LE: loop exit
PB: predicated region body
PF: predicated region fallthrough
CT: control target
= control target key end

     0   :  { %12 = vsyncpa [#allocation3], 0  ;;  %s2632_s0 = inlined_call_operand.vmem [shape: f32[1,64], index: 0, kind: input, shape index: {}]   ;;  %s2633_s1 = inlined_call_operand.vmem [shape: bf16[64,256], index: 1, kind: input, shape index: {}]   ;;  %s2634_s2 = inlined_call_operand.vmem [shape: f32[1,256], index: 2, kind: input, shape index: {}]   ;;  %s2635_s3 = inlined_call_operand.hbm [shape: bf16[6,256,256], index: 3, kind: input, shape index: {}]   ;;  %s2636_s4 = inlined_call_operand.vmem [shape: f32[6,1,256], index: 4, kind: input, shape index: {}]   ;;  %s2637_s5 = inlined_call_operand.vmem [shape: bf16[256,8], index: 5, kind: input, shape index: {}]   ;;  %s2638_s6 = inlined_call_operand.vmem [shape: f32[1,8], index: 6, kind: input, shape index: {}]   ;;  %s2639_s7 = inlined_call_operand.hbm [shape: f32[1,8], index: 7, kind: output, shape index: {}]  }
   0x1   :  { %13 = vsyncpa [#allocation4], 0  ;;  %s2446_s24 = smov [#allocation2]   ;;  %s2398_s28 = scalar_lea.hbm %s2635_s3, 24576 }
   0x2   :  { %s25_s25 = sshll.u32 %s2446_s24, 4  ;;  %p2399_p0 = scmp.ne.s32.totalorder %s2635_s3, %s2398_s28  ;;  %s26_s25 = int_to_ptr.vmem [resolvable:$true] %s25_s25 }
   0x3   :  { %p2402_p1 = scmp.lt.u32.totalorder %s2398_s28, %s2635_s3 }
   0x5   :  { %p2404_p2 = pnand %p2402_p1, %p2399_p0 }
   0x7   :  { %2407 = shalt.err (!%p2404_p2)
}
   0x8   :  { %s2408_s10 = scalar_lea.vmem %s26_s25, 24576  ;;  %p2413_p4 = scmp.lt.s32.totalorder %s26_s25, %s26_s25 }
   0x9   :  { %p2409_p3 = scmp.ne.s32.totalorder %s26_s25, %s2408_s10  ;;  %p2414_p5 = scmp.lt.s32.totalorder %s2408_s10, %s2408_s10 }
   0xb   :  { %p2415_p6 = por %p2414_p5, %p2413_p4 }
   0xd   :  { %p2416_p7 = pnand %p2415_p6, %p2409_p3 }
   0xf   :  { %2419 = shalt.err (!%p2416_p7)
}
  0x10   :  { %s2447_s11 = smov 128   ;;  %s2448_s12 = smov 8  }
  0x11   :  { %31 = dma.hbm_to_vmem [thread:$0]  %s2635_s3, 24576, %s26_s25, [#allocation3], %s2447_s11, %s2447_s11, %s2448_s12  }
  0x12   :  { %2442 = dma.done.wait [#allocation3], 24576  }
  0x13   :  { %2443 = vsyncadd [#allocation3], 4294942720  ;;  %v2449_v0 = vmov 0   ;;  %v2082_v1 = vld [vmem:[%s2633_s1 + $0x4] ss:$8 sps:$4 sm:$0xff]   ;;  %vm104_vm0 = vcmask 523264  }
  0x14   :  { %140 = vmatprep.mubr.bf16.mxu0 %v2449_v0  ;;  %v2084_v2 = vld [vmem:[%s2633_s1] ss:$8 sps:$4 sm:$0xff]   ;;  %108 = vmatprep.subr.bf16.mxu0 %v2082_v1  ;;  %v2085_v3 = vld [vmem:[%s2633_s1 + $0x14] ss:$8 sps:$4 sm:$0xff]   ;;  %v2087_v4 = vld [vmem:[%s2633_s1 + $0x10] ss:$8 sps:$4 sm:$0xff]  }
  0x15   :  { %109 = vmatpush1.bf16.msra.mxu0 %v2084_v2  ;;  %v2088_v5 = vld [vmem:[%s2633_s1 + $0x24] ss:$8 sps:$4 sm:$0xff]   ;;  %v2090_v6 = vld [vmem:[%s2633_s1 + $0x20] ss:$8 sps:$4 sm:$0xff]   ;;  %v2091_v10 = vld [vmem:[%s2633_s1 + $0x34] ss:$8 sps:$4 sm:$0xff]  }
  0x16   :  { %110 = vmatprep.subr.bf16.mxu0 %v2085_v3  ;;  %v2094_v7 = vld [vmem:[#allocation2 + $0x4] ss:$8 sps:$4 sm:$0xff]   ;;  %v2096_v8 = vld [vmem:[#allocation2] ss:$8 sps:$4 sm:$0xff]   ;;  %v2097_v9 = vld [vmem:[#allocation2 + $0x14] ss:$8 sps:$4 sm:$0xff]  }
  0x17   :  { %362 = vmatprep.subr.bf16.mxu1 %v2094_v7  ;;  %v2099_v11 = vld [vmem:[#allocation2 + $0x10] ss:$8 sps:$4 sm:$0xff]   ;;  %v2100_v13 = vld [vmem:[#allocation2 + $0x24] ss:$8 sps:$4 sm:$0xff]   ;;  %v2102_v15 = vld [vmem:[#allocation2 + $0x20] ss:$8 sps:$4 sm:$0xff]   ;;  %v94_v7 = vlaneseq }
  0x18   :  { %363 = vmatpush1.bf16.msra.mxu1 %v2096_v8  ;;  %v2093_v12 = vld [vmem:[%s2633_s1 + $0x30] ss:$8 sps:$4 sm:$0xff]   ;;  %v42_v14 = vld [vmem:[%s2632_s0] sm:$0x1]  ;;  %v2103_v17 = vld [vmem:[#allocation2 + $0x34] ss:$8 sps:$4 sm:$0xff]  }
  0x19   :  { %111 = vmatpush1.bf16.msra.mxu0 %v2087_v4  ;;  %364 = vmatprep.subr.bf16.mxu1 %v2097_v9  ;;  %v43_v16 = vpack.c.bf16 %v42_v14, %v42_v14  ;;  %v2105_v18 = vld [vmem:[#allocation2 + $0x30] ss:$8 sps:$4 sm:$0xff]   ;;  %v2106_v19 = vld [vmem:[#allocation2 + $0x44] ss:$8 sps:$4 sm:$0xff]   ;;  %v2108_v20 = vld [vmem:[#allocation2 + $0x40] ss:$8 sps:$4 sm:$0xff]  }
  0x1a   :  { %112 = vmatprep.subr.bf16.mxu0 %v2088_v5  ;;  %v2109_v21 = vld [vmem:[#allocation2 + $0x54] ss:$8 sps:$4 sm:$0xff]   ;;  %v2111_v22 = vld [vmem:[#allocation2 + $0x50] ss:$8 sps:$4 sm:$0xff]   ;;  %v2112_v23 = vld [vmem:[#allocation2 + $0x64] ss:$8 sps:$4 sm:$0xff]  }
  0x1b   :  { %v2114_v24 = vld [vmem:[#allocation2 + $0x60] ss:$8 sps:$4 sm:$0xff]   ;;  %v2115_v25 = vld [vmem:[#allocation2 + $0x74] ss:$8 sps:$4 sm:$0xff]   ;;  %v2117_v26 = vld [vmem:[#allocation2 + $0x70] ss:$8 sps:$4 sm:$0xff]  }
  0x1c   :  { %365 = vmatpush1.bf16.msra.mxu1 %v2099_v11  ;;  %v2118_v27 = vld [vmem:[#allocation2 + $0x84] ss:$8 sps:$4 sm:$0xff]   ;;  %v2120_v28 = vld [vmem:[#allocation2 + $0x80] ss:$8 sps:$4 sm:$0xff]   ;;  %v2121_v29 = vld [vmem:[#allocation2 + $0x94] ss:$8 sps:$4 sm:$0xff]  }
  0x1d   :  { %113 = vmatpush1.bf16.msra.mxu0 %v2090_v6  ;;  %366 = vmatprep.subr.bf16.mxu1 %v2100_v13  ;;  %v2123_v30 = vld [vmem:[#allocation2 + $0x90] ss:$8 sps:$4 sm:$0xff]   ;;  %v2124_v31 = vld [vmem:[#allocation2 + $0xa4] ss:$8 sps:$4 sm:$0xff]   ;;  %v2126_v32 = vld [vmem:[#allocation2 + $0xa0] ss:$8 sps:$4 sm:$0xff]  }
  0x1e   :  { %114 = vmatprep.subr.bf16.mxu0 %v2091_v10  ;;  %v2127_v33 = vld [vmem:[#allocation2 + $0xb4] ss:$8 sps:$4 sm:$0xff]   ;;  %v2129_v34 = vld [vmem:[#allocation2 + $0xb0] ss:$8 sps:$4 sm:$0xff]   ;;  %v2130_v35 = vld [vmem:[#allocation2 + $0xc4] ss:$8 sps:$4 sm:$0xff]  }
  0x1f   :  { %v2132_v36 = vld [vmem:[#allocation2 + $0xc0] ss:$8 sps:$4 sm:$0xff]   ;;  %v2133_v37 = vld [vmem:[#allocation2 + $0xd4] ss:$8 sps:$4 sm:$0xff]   ;;  %v2135_v38 = vld [vmem:[#allocation2 + $0xd0] ss:$8 sps:$4 sm:$0xff]  }
  0x20   :  { %367 = vmatpush1.bf16.msra.mxu1 %v2102_v15  ;;  %v2136_v39 = vld [vmem:[#allocation2 + $0xe4] ss:$8 sps:$4 sm:$0xff]   ;;  %v2138_v40 = vld [vmem:[#allocation2 + $0xe0] ss:$8 sps:$4 sm:$0xff]   ;;  %v2139_v41 = vld [vmem:[#allocation2 + $0xf4] ss:$8 sps:$4 sm:$0xff]  }
  0x21   :  { %115 = vmatpush1.bf16.msra.mxu0 %v2093_v12  ;;  %368 = vmatprep.subr.bf16.mxu1 %v2103_v17  ;;  %v2141_v42 = vld [vmem:[#allocation2 + $0xf0] ss:$8 sps:$4 sm:$0xff]   ;;  %v2142_v43 = vld [vmem:[#allocation2 + $0x100] ss:$8 sps:$4 sm:$0xff]   ;;  %v2144_v44 = vld [vmem:[#allocation2 + $0x104] ss:$8 sps:$4 sm:$0xff]  }
  0x22   :  { %v2147_v45 = vld [vmem:[#allocation2 + $0x114] ss:$8 sps:$4 sm:$0xff]   ;;  %611 = vmatprep.subr.bf16.mxu0 %v2144_v44  ;;  %v2145_v46 = vld [vmem:[#allocation2 + $0x110] ss:$8 sps:$4 sm:$0xff]   ;;  %v2150_v47 = vld [vmem:[#allocation2 + $0x124] ss:$8 sps:$4 sm:$0xff]  }
  0x23   :  { %v2148_v48 = vld [vmem:[#allocation2 + $0x120] ss:$8 sps:$4 sm:$0xff]   ;;  %v2153_v49 = vld [vmem:[#allocation2 + $0x134] ss:$8 sps:$4 sm:$0xff]   ;;  %v2151_v50 = vld [vmem:[#allocation2 + $0x130] ss:$8 sps:$4 sm:$0xff]  }
  0x24   :  { %1846 = vmatmul.mubr.msk.bf16.vlgmr.msra.gmra.mrb[0].mxu0 %vm104_vm0, %v43_v16  ;;  %369 = vmatpush1.bf16.msra.mxu1 %v2105_v18  ;;  %v2156_v51 = vld [vmem:[#allocation2 + $0x144] ss:$8 sps:$4 sm:$0xff]   ;;  %v2154_v52 = vld [vmem:[#allocation2 + $0x140] ss:$8 sps:$4 sm:$0xff]   ;;  %v2159_v53 = vld [vmem:[#allocation2 + $0x154] ss:$8 sps:$4 sm:$0xff]  }
  0x25   :  { %370 = vmatprep.subr.bf16.mxu1 %v2106_v19  ;;  %612 = vmatpush1.bf16.msra.mxu0 %v2142_v43  ;;  %v2157_v54 = vld [vmem:[#allocation2 + $0x150] ss:$8 sps:$4 sm:$0xff]   ;;  %v2162_v55 = vld [vmem:[#allocation2 + $0x164] ss:$8 sps:$4 sm:$0xff]   ;;  %v2160_v56 = vld [vmem:[#allocation2 + $0x160] ss:$8 sps:$4 sm:$0xff]  }
  0x26   :  { %613 = vmatprep.subr.bf16.mxu0 %v2147_v45  ;;  %v2165_v57 = vld [vmem:[#allocation2 + $0x174] ss:$8 sps:$4 sm:$0xff]   ;;  %v2163_v58 = vld [vmem:[#allocation2 + $0x170] ss:$8 sps:$4 sm:$0xff]   ;;  %v2168_v59 = vld [vmem:[#allocation2 + $0x184] ss:$8 sps:$4 sm:$0xff]  }
  0x27   :  { %v2166_v60 = vld [vmem:[#allocation2 + $0x180] ss:$8 sps:$4 sm:$0xff]   ;;  %v2171_v61 = vld [vmem:[#allocation2 + $0x194] ss:$8 sps:$4 sm:$0xff]   ;;  %v2169_v62 = vld [vmem:[#allocation2 + $0x190] ss:$8 sps:$4 sm:$0xff]  }
  0x28   :  { %371 = vmatpush1.bf16.msra.mxu1 %v2108_v20  ;;  %v2174_v63 = vld [vmem:[#allocation2 + $0x1a4] ss:$8 sps:$4 sm:$0xff]   ;;  %v2172_v0 = vld [vmem:[#allocation2 + $0x1a0] ss:$8 sps:$4 sm:$0xff]   ;;  %v2177_v1 = vld [vmem:[#allocation2 + $0x1b4] ss:$8 sps:$4 sm:$0xff]  }
  0x29   :  { %372 = vmatprep.subr.bf16.mxu1 %v2109_v21  ;;  %614 = vmatpush1.bf16.msra.mxu0 %v2145_v46  ;;  %v2175_v2 = vld [vmem:[#allocation2 + $0x1b0] ss:$8 sps:$4 sm:$0xff]   ;;  %v2180_v3 = vld [vmem:[#allocation2 + $0x1c4] ss:$8 sps:$4 sm:$0xff]   ;;  %v2178_v4 = vld [vmem:[#allocation2 + $0x1c0] ss:$8 sps:$4 sm:$0xff]  }
  0x2a   :  { %615 = vmatprep.subr.bf16.mxu0 %v2150_v47  ;;  %v2183_v5 = vld [vmem:[#allocation2 + $0x1d4] ss:$8 sps:$4 sm:$0xff]   ;;  %v2181_v6 = vld [vmem:[#allocation2 + $0x1d0] ss:$8 sps:$4 sm:$0xff]   ;;  %v95_v8 = vshrl.u32 %v94_v7, 7  ;;  %vm1821_vm1 = vcmask 57344  }
  0x2b   :  { %v52_v10 = vld [vmem:[%s2634_s2] sm:$0x3]  ;;  %v2216_v44 = vld [vmem:[#allocation2 + $0x284] ss:$8 sps:$4 sm:$0xff]   ;;  %v2214_v45 = vld [vmem:[#allocation2 + $0x280] ss:$8 sps:$4 sm:$0xff]  }
  0x2c   :  { %373 = vmatpush1.bf16.msra.mxu1 %v2111_v22  ;;  %v2530_v9 = vsub.s32 0, %v95_v8  ;;  %v2535_v11 = vsub.s32 1, %v95_v8  ;;  %v2211_v43 = vld [vmem:[#allocation2 + $0x270] ss:$8 sps:$4 sm:$0xff]   ;;  %v2219_v46 = vld [vmem:[#allocation2 + $0x294] ss:$8 sps:$4 sm:$0xff]  }
  0x2d   :  { %374 = vmatprep.subr.bf16.mxu1 %v2112_v23  ;;  %616 = vmatpush1.bf16.msra.mxu0 %v2148_v48  ;;  %v2217_v47 = vld [vmem:[#allocation2 + $0x290] ss:$8 sps:$4 sm:$0xff]   ;;  %v2222_v48 = vld [vmem:[#allocation2 + $0x2a4] ss:$8 sps:$4 sm:$0xff]   ;;  %v2237_v7 = vld [vmem:[#allocation2 + $0x2f4] ss:$8 sps:$4 sm:$0xff]  }
  0x2e   :  { %617 = vmatprep.subr.bf16.mxu0 %v2153_v49  ;;  %v97_v12 = vrot.slane %v52_v10, %v2530_v9  ;;  %v101_v13 = vrot.slane %v52_v10, %v2535_v11  ;;  %v2220_v49 = vld [vmem:[#allocation2 + $0x2a0] ss:$8 sps:$4 sm:$0xff]   ;;  %v2235_v8 = vld [vmem:[#allocation2 + $0x2f0] ss:$8 sps:$4 sm:$0xff]  }
  0x2f   :  { %v2238_v10 = vld [vmem:[#allocation2 + $0x300] ss:$8 sps:$4 sm:$0xff]  }
  0x30   :  { %375 = vmatpush1.bf16.msra.mxu1 %v2114_v24  ;;  %v2186_v24 = vld [vmem:[#allocation2 + $0x1e4] ss:$8 sps:$4 sm:$0xff]  }
  0x31   :  { %376 = vmatprep.subr.bf16.mxu1 %v2115_v25  ;;  %618 = vmatpush1.bf16.msra.mxu0 %v2151_v50  ;;  %v2184_v25 = vld [vmem:[#allocation2 + $0x1e0] ss:$8 sps:$4 sm:$0xff]   ;;  %v2225_v50 = vld [vmem:[#allocation2 + $0x2b4] ss:$8 sps:$4 sm:$0xff]  }
  0x32   :  { %619 = vmatprep.subr.bf16.mxu0 %v2156_v51  ;;  %v2223_v51 = vld [vmem:[#allocation2 + $0x2b0] ss:$8 sps:$4 sm:$0xff]  }
  0x34   :  { %377 = vmatpush1.bf16.msra.mxu1 %v2117_v26  ;;  %v2189_v26 = vld [vmem:[#allocation2 + $0x1f4] ss:$8 sps:$4 sm:$0xff]  }
  0x35   :  { %378 = vmatprep.subr.bf16.mxu1 %v2118_v27  ;;  %620 = vmatpush1.bf16.msra.mxu0 %v2154_v52  ;;  %v2187_v27 = vld [vmem:[#allocation2 + $0x1f0] ss:$8 sps:$4 sm:$0xff]   ;;  %v2228_v52 = vld [vmem:[#allocation2 + $0x2c4] ss:$8 sps:$4 sm:$0xff]  }
  0x36   :  { %621 = vmatprep.subr.bf16.mxu0 %v2159_v53  ;;  %v2226_v53 = vld [vmem:[#allocation2 + $0x2c0] ss:$8 sps:$4 sm:$0xff]  }
  0x38   :  { %379 = vmatpush1.bf16.msra.mxu1 %v2120_v28  ;;  %v2190_v28 = vld [vmem:[#allocation2 + $0x200] ss:$8 sps:$4 sm:$0xff]  }
  0x39   :  { %380 = vmatprep.subr.bf16.mxu1 %v2121_v29  ;;  %622 = vmatpush1.bf16.msra.mxu0 %v2157_v54  ;;  %v2192_v29 = vld [vmem:[#allocation2 + $0x204] ss:$8 sps:$4 sm:$0xff]   ;;  %v2231_v54 = vld [vmem:[#allocation2 + $0x2d4] ss:$8 sps:$4 sm:$0xff]  }
  0x3a   :  { %623 = vmatprep.subr.bf16.mxu0 %v2162_v55  ;;  %v2229_v55 = vld [vmem:[#allocation2 + $0x2d0] ss:$8 sps:$4 sm:$0xff]  }
  0x3c   :  { %381 = vmatpush1.bf16.msra.mxu1 %v2123_v30  ;;  %v2195_v30 = vld [vmem:[#allocation2 + $0x214] ss:$8 sps:$4 sm:$0xff]  }
  0x3d   :  { %382 = vmatprep.subr.bf16.mxu1 %v2124_v31  ;;  %624 = vmatpush1.bf16.msra.mxu0 %v2160_v56  ;;  %v2193_v31 = vld [vmem:[#allocation2 + $0x210] ss:$8 sps:$4 sm:$0xff]  }
  0x3e   :  { %625 = vmatprep.subr.bf16.mxu0 %v2165_v57  ;;  %v151_v56 = vld [vmem:[%s2636_s4] sm:$0x3] }
  0x3f   :  { %v355_v57 = vrot.slane %v151_v56, %v2530_v9 }
  0x40   :  { %383 = vmatpush1.bf16.msra.mxu1 %v2126_v32  ;;  %v2198_v32 = vld [vmem:[#allocation2 + $0x224] ss:$8 sps:$4 sm:$0xff]  }
  0x41   :  { %384 = vmatprep.subr.bf16.mxu1 %v2127_v33  ;;  %626 = vmatpush1.bf16.msra.mxu0 %v2163_v58  ;;  %v2196_v33 = vld [vmem:[#allocation2 + $0x220] ss:$8 sps:$4 sm:$0xff]   ;;  %v359_v58 = vrot.slane %v151_v56, %v2535_v11 }
  0x42   :  { %627 = vmatprep.subr.bf16.mxu0 %v2168_v59  ;;  %v2286_v56 = vld [vmem:[#allocation2 + $0x400] ss:$8 sps:$4 sm:$0xff]  }
  0x44   :  { %385 = vmatpush1.bf16.msra.mxu1 %v2129_v34  ;;  %v2201_v34 = vld [vmem:[#allocation2 + $0x234] ss:$8 sps:$4 sm:$0xff]  }
  0x45   :  { %386 = vmatprep.subr.bf16.mxu1 %v2130_v35  ;;  %628 = vmatpush1.bf16.msra.mxu0 %v2166_v60  ;;  %v2199_v35 = vld [vmem:[#allocation2 + $0x230] ss:$8 sps:$4 sm:$0xff]  }
  0x46   :  { %629 = vmatprep.subr.bf16.mxu0 %v2171_v61 }
  0x48   :  { %387 = vmatpush1.bf16.msra.mxu1 %v2132_v36  ;;  %v2204_v36 = vld [vmem:[#allocation2 + $0x244] ss:$8 sps:$4 sm:$0xff]  }
  0x49   :  { %388 = vmatprep.subr.bf16.mxu1 %v2133_v37  ;;  %630 = vmatpush1.bf16.msra.mxu0 %v2169_v62  ;;  %v2202_v37 = vld [vmem:[#allocation2 + $0x240] ss:$8 sps:$4 sm:$0xff]  }
  0x4a   :  { %631 = vmatprep.subr.bf16.mxu0 %v2174_v63 }
  0x4c   :  { %389 = vmatpush1.bf16.msra.mxu1 %v2135_v38  ;;  %v2207_v38 = vld [vmem:[#allocation2 + $0x254] ss:$8 sps:$4 sm:$0xff]  }
  0x4d   :  { %390 = vmatprep.subr.bf16.mxu1 %v2136_v39  ;;  %632 = vmatpush1.bf16.msra.mxu0 %v2172_v0  ;;  %v2205_v39 = vld [vmem:[#allocation2 + $0x250] ss:$8 sps:$4 sm:$0xff]  }
  0x4e   :  { %633 = vmatprep.subr.bf16.mxu0 %v2177_v1 }
  0x50   :  { %391 = vmatpush1.bf16.msra.mxu1 %v2138_v40  ;;  %v2210_v40 = vld [vmem:[#allocation2 + $0x264] ss:$8 sps:$4 sm:$0xff]  }
  0x51   :  { %392 = vmatprep.subr.bf16.mxu1 %v2139_v41  ;;  %634 = vmatpush1.bf16.msra.mxu0 %v2175_v2  ;;  %v2208_v41 = vld [vmem:[#allocation2 + $0x260] ss:$8 sps:$4 sm:$0xff]  }
  0x52   :  { %635 = vmatprep.subr.bf16.mxu0 %v2180_v3 }
  0x54   :  { %393 = vmatpush1.bf16.msra.mxu1 %v2141_v42  ;;  %v2213_v42 = vld [vmem:[#allocation2 + $0x274] ss:$8 sps:$4 sm:$0xff]  }
  0x55   :  { %636 = vmatpush1.bf16.msra.mxu0 %v2178_v4  ;;  %860 = vmatprep.subr.bf16.mxu1 %v2192_v29  ;;  %v2267_v29 = vld [vmem:[#allocation2 + $0x394] ss:$8 sps:$4 sm:$0xff]  }
  0x56   :  { %637 = vmatprep.subr.bf16.mxu0 %v2183_v5  ;;  %v2234_v5 = vld [vmem:[#allocation2 + $0x2e4] ss:$8 sps:$4 sm:$0xff]  }
  0x59   :  { %638 = vmatpush1.bf16.msra.mxu0 %v2181_v6  ;;  %v2232_v6 = vld [vmem:[#allocation2 + $0x2e0] ss:$8 sps:$4 sm:$0xff]  }
  0x5a   :  { %639 = vmatprep.subr.bf16.mxu0 %v2186_v24  ;;  %v2256_v24 = vld [vmem:[#allocation2 + $0x360] ss:$8 sps:$4 sm:$0xff]  }
  0x5d   :  { %640 = vmatpush1.bf16.msra.mxu0 %v2184_v25  ;;  %v2261_v25 = vld [vmem:[#allocation2 + $0x374] ss:$8 sps:$4 sm:$0xff]  }
  0x5e   :  { %641 = vmatprep.subr.bf16.mxu0 %v2189_v26  ;;  %v2259_v26 = vld [vmem:[#allocation2 + $0x370] ss:$8 sps:$4 sm:$0xff]  }
  0x61   :  { %642 = vmatpush1.bf16.msra.mxu0 %v2187_v27  ;;  %v2264_v27 = vld [vmem:[#allocation2 + $0x384] ss:$8 sps:$4 sm:$0xff]  }
  0xf7   :  { %v142_v14 = vpop.f32.mrb[0].mxu0 }
  0xf8   :  { %v143_v15 = vadd.f32 %v142_v14, %v97_v12  ;;  %v144_v16 = vpop.f32.mrb[1].mxu0  ;;  %v2240_v12 = vld [vmem:[#allocation2 + $0x304] ss:$8 sps:$4 sm:$0xff]   ;;  %v2241_v14 = vld [vmem:[#allocation2 + $0x310] ss:$8 sps:$4 sm:$0xff]  }
  0xf9   :  { %v145_v17 = vadd.f32 %v144_v16, %v101_v13  ;;  %v146_v18 = vpop.f32.mrb[2].mxu0  ;;  %v2243_v13 = vld [vmem:[#allocation2 + $0x314] ss:$8 sps:$4 sm:$0xff]   ;;  %1109 = vmatprep.subr.bf16.mxu0 %v2240_v12  ;;  %v2244_v16 = vld [vmem:[#allocation2 + $0x320] ss:$8 sps:$4 sm:$0xff]  }
  0xfa   :  { %v149_v19 = vmax.f32 %v143_v15, 0.0  ;;  %v147_v20 = vpop.f32.mrb[3].mxu0  ;;  %v2246_v15 = vld [vmem:[#allocation2 + $0x324] ss:$8 sps:$4 sm:$0xff]   ;;  %v2247_v18 = vld [vmem:[#allocation2 + $0x330] ss:$8 sps:$4 sm:$0xff]  }
  0xfb   :  { %v150_v21 = vmax.f32 %v145_v17, 0.0  ;;  %v2249_v17 = vld [vmem:[#allocation2 + $0x334] ss:$8 sps:$4 sm:$0xff]   ;;  %v2250_v20 = vld [vmem:[#allocation2 + $0x340] ss:$8 sps:$4 sm:$0xff]  }
  0xfc   :  { %v157_v23 = vpack.c.bf16 %v149_v19, %v149_v19  ;;  %v2252_v19 = vld [vmem:[#allocation2 + $0x344] ss:$8 sps:$4 sm:$0xff]   ;;  %v2315_v12 = vld [vmem:[#allocation2 + $0x494] ss:$8 sps:$4 sm:$0xff]  }
  0xfd   :  { %v158_v22 = vpack.c.bf16 %v150_v21, %v150_v21  ;;  %v2255_v21 = vld [vmem:[#allocation2 + $0x354] ss:$8 sps:$4 sm:$0xff]  }
  0xff   :  { %394 = vmatprep.mubr.bf16.mxu1 %v158_v22  ;;  %v2253_v22 = vld [vmem:[#allocation2 + $0x350] ss:$8 sps:$4 sm:$0xff]  }
 0x100   :  { %395 = vmatmul.mubr.bf16.vlgmr.msra.gmra.mrb[0].mxu1 %v157_v23  ;;  %v2258_v23 = vld [vmem:[#allocation2 + $0x364] ss:$8 sps:$4 sm:$0xff]  }
 0x101   :  { %861 = vmatpush1.bf16.msra.mxu1 %v2190_v28  ;;  %v2262_v28 = vld [vmem:[#allocation2 + $0x380] ss:$8 sps:$4 sm:$0xff]  }
 0x102   :  { %862 = vmatprep.subr.bf16.mxu1 %v2195_v30  ;;  %v2265_v30 = vld [vmem:[#allocation2 + $0x390] ss:$8 sps:$4 sm:$0xff]  }
 0x105   :  { %863 = vmatpush1.bf16.msra.mxu1 %v2193_v31  ;;  %v2270_v31 = vld [vmem:[#allocation2 + $0x3a4] ss:$8 sps:$4 sm:$0xff]  }
 0x106   :  { %864 = vmatprep.subr.bf16.mxu1 %v2198_v32  ;;  %v2268_v32 = vld [vmem:[#allocation2 + $0x3a0] ss:$8 sps:$4 sm:$0xff]  }
 0x109   :  { %865 = vmatpush1.bf16.msra.mxu1 %v2196_v33  ;;  %v2273_v33 = vld [vmem:[#allocation2 + $0x3b4] ss:$8 sps:$4 sm:$0xff]  }
 0x10a   :  { %866 = vmatprep.subr.bf16.mxu1 %v2201_v34  ;;  %v2271_v34 = vld [vmem:[#allocation2 + $0x3b0] ss:$8 sps:$4 sm:$0xff]  }
 0x10d   :  { %867 = vmatpush1.bf16.msra.mxu1 %v2199_v35  ;;  %v2276_v35 = vld [vmem:[#allocation2 + $0x3c4] ss:$8 sps:$4 sm:$0xff]  }
 0x10e   :  { %868 = vmatprep.subr.bf16.mxu1 %v2204_v36  ;;  %v2274_v36 = vld [vmem:[#allocation2 + $0x3c0] ss:$8 sps:$4 sm:$0xff]  }
 0x111   :  { %869 = vmatpush1.bf16.msra.mxu1 %v2202_v37  ;;  %v2279_v37 = vld [vmem:[#allocation2 + $0x3d4] ss:$8 sps:$4 sm:$0xff]  }
 0x112   :  { %870 = vmatprep.subr.bf16.mxu1 %v2207_v38  ;;  %v2277_v38 = vld [vmem:[#allocation2 + $0x3d0] ss:$8 sps:$4 sm:$0xff]  }
 0x115   :  { %871 = vmatpush1.bf16.msra.mxu1 %v2205_v39  ;;  %v152_v39 = vld [vmem:[%s2636_s4 + $0x2] sm:$0x3] }
 0x116   :  { %872 = vmatprep.subr.bf16.mxu1 %v2210_v40  ;;  %v604_v40 = vrot.slane %v152_v39, %v2530_v9 }
 0x119   :  { %873 = vmatpush1.bf16.msra.mxu1 %v2208_v41  ;;  %v608_v41 = vrot.slane %v152_v39, %v2535_v11  ;;  %v2334_v39 = vld [vmem:[#allocation2 + $0x500] ss:$8 sps:$4 sm:$0xff]  }
 0x11a   :  { %874 = vmatprep.subr.bf16.mxu1 %v2213_v42 }
 0x11d   :  { %875 = vmatpush1.bf16.msra.mxu1 %v2211_v43 }
 0x11e   :  { %876 = vmatprep.subr.bf16.mxu1 %v2216_v44 }
 0x121   :  { %877 = vmatpush1.bf16.msra.mxu1 %v2214_v45 }
 0x122   :  { %878 = vmatprep.subr.bf16.mxu1 %v2219_v46 }
 0x125   :  { %879 = vmatpush1.bf16.msra.mxu1 %v2217_v47 }
 0x126   :  { %880 = vmatprep.subr.bf16.mxu1 %v2222_v48 }
 0x129   :  { %881 = vmatpush1.bf16.msra.mxu1 %v2220_v49 }
 0x12a   :  { %882 = vmatprep.subr.bf16.mxu1 %v2225_v50 }
 0x12d   :  { %883 = vmatpush1.bf16.msra.mxu1 %v2223_v51 }
 0x12e   :  { %884 = vmatprep.subr.bf16.mxu1 %v2228_v52  ;;  %v2282_v52 = vld [vmem:[#allocation2 + $0x3e4] ss:$8 sps:$4 sm:$0xff]  }
 0x131   :  { %885 = vmatpush1.bf16.msra.mxu1 %v2226_v53  ;;  %v2280_v53 = vld [vmem:[#allocation2 + $0x3e0] ss:$8 sps:$4 sm:$0xff]  }
 0x132   :  { %886 = vmatprep.subr.bf16.mxu1 %v2231_v54  ;;  %v2285_v54 = vld [vmem:[#allocation2 + $0x3f4] ss:$8 sps:$4 sm:$0xff]  }
 0x135   :  { %887 = vmatpush1.bf16.msra.mxu1 %v2229_v55  ;;  %v2283_v55 = vld [vmem:[#allocation2 + $0x3f0] ss:$8 sps:$4 sm:$0xff]  }
 0x136   :  { %888 = vmatprep.subr.bf16.mxu1 %v2234_v5  ;;  %v2304_v5 = vld [vmem:[#allocation2 + $0x460] ss:$8 sps:$4 sm:$0xff]  }
 0x139   :  { %889 = vmatpush1.bf16.msra.mxu1 %v2232_v6  ;;  %v2309_v6 = vld [vmem:[#allocation2 + $0x474] ss:$8 sps:$4 sm:$0xff]  }
 0x13a   :  { %890 = vmatprep.subr.bf16.mxu1 %v2237_v7  ;;  %v2307_v7 = vld [vmem:[#allocation2 + $0x470] ss:$8 sps:$4 sm:$0xff]  }
 0x13d   :  { %891 = vmatpush1.bf16.msra.mxu1 %v2235_v8  ;;  %v2312_v8 = vld [vmem:[#allocation2 + $0x484] ss:$8 sps:$4 sm:$0xff]  }
 0x1d3   :  { %v396_v59 = vpop.f32.mrb[0].mxu1 }
 0x1d4   :  { %v397_v60 = vadd.f32 %v396_v59, %v355_v57  ;;  %v398_v61 = vpop.f32.mrb[1].mxu1  ;;  %v2288_v57 = vld [vmem:[#allocation2 + $0x404] ss:$8 sps:$4 sm:$0xff]   ;;  %v2289_v59 = vld [vmem:[#allocation2 + $0x410] ss:$8 sps:$4 sm:$0xff]  }
 0x1d5   :  { %v399_v62 = vadd.f32 %v398_v61, %v359_v58  ;;  %v400_v63 = vpop.f32.mrb[2].mxu1  ;;  %v2291_v58 = vld [vmem:[#allocation2 + $0x414] ss:$8 sps:$4 sm:$0xff]   ;;  %1358 = vmatprep.subr.bf16.mxu1 %v2288_v57  ;;  %v2292_v61 = vld [vmem:[#allocation2 + $0x420] ss:$8 sps:$4 sm:$0xff]  }
 0x1d6   :  { %v403_v0 = vmax.f32 %v397_v60, 0.0  ;;  %v401_v1 = vpop.f32.mrb[3].mxu1  ;;  %v2294_v60 = vld [vmem:[#allocation2 + $0x424] ss:$8 sps:$4 sm:$0xff]   ;;  %v2295_v63 = vld [vmem:[#allocation2 + $0x430] ss:$8 sps:$4 sm:$0xff]  }
 0x1d7   :  { %v404_v2 = vmax.f32 %v399_v62, 0.0  ;;  %v2297_v62 = vld [vmem:[#allocation2 + $0x434] ss:$8 sps:$4 sm:$0xff]   ;;  %v2298_v1 = vld [vmem:[#allocation2 + $0x440] ss:$8 sps:$4 sm:$0xff]  }
 0x1d8   :  { %v405_v4 = vpack.c.bf16 %v403_v0, %v403_v0  ;;  %v2300_v0 = vld [vmem:[#allocation2 + $0x444] ss:$8 sps:$4 sm:$0xff]   ;;  %v2363_v57 = vld [vmem:[#allocation2 + $0x594] ss:$8 sps:$4 sm:$0xff]  }
 0x1d9   :  { %v406_v3 = vpack.c.bf16 %v404_v2, %v404_v2  ;;  %v2303_v2 = vld [vmem:[#allocation2 + $0x454] ss:$8 sps:$4 sm:$0xff]  }
 0x1db   :  { %643 = vmatprep.mubr.bf16.mxu0 %v406_v3  ;;  %v2301_v3 = vld [vmem:[#allocation2 + $0x450] ss:$8 sps:$4 sm:$0xff]  }
 0x1dc   :  { %644 = vmatmul.mubr.bf16.vlgmr.msra.gmra.mrb[4].mxu0 %v405_v4  ;;  %v2306_v4 = vld [vmem:[#allocation2 + $0x464] ss:$8 sps:$4 sm:$0xff]  }
 0x1dd   :  { %1110 = vmatpush1.bf16.msra.mxu0 %v2238_v10  ;;  %v2310_v10 = vld [vmem:[#allocation2 + $0x480] ss:$8 sps:$4 sm:$0xff]  }
 0x1de   :  { %1111 = vmatprep.subr.bf16.mxu0 %v2243_v13  ;;  %v2313_v13 = vld [vmem:[#allocation2 + $0x490] ss:$8 sps:$4 sm:$0xff]  }
 0x1e1   :  { %1112 = vmatpush1.bf16.msra.mxu0 %v2241_v14  ;;  %v2318_v14 = vld [vmem:[#allocation2 + $0x4a4] ss:$8 sps:$4 sm:$0xff]  }
 0x1e2   :  { %1113 = vmatprep.subr.bf16.mxu0 %v2246_v15  ;;  %v2316_v15 = vld [vmem:[#allocation2 + $0x4a0] ss:$8 sps:$4 sm:$0xff]  }
 0x1e5   :  { %1114 = vmatpush1.bf16.msra.mxu0 %v2244_v16  ;;  %v2321_v16 = vld [vmem:[#allocation2 + $0x4b4] ss:$8 sps:$4 sm:$0xff]  }
 0x1e6   :  { %1115 = vmatprep.subr.bf16.mxu0 %v2249_v17  ;;  %v2319_v17 = vld [vmem:[#allocation2 + $0x4b0] ss:$8 sps:$4 sm:$0xff]  }
 0x1e9   :  { %1116 = vmatpush1.bf16.msra.mxu0 %v2247_v18  ;;  %v2324_v18 = vld [vmem:[#allocation2 + $0x4c4] ss:$8 sps:$4 sm:$0xff]  }
 0x1ea   :  { %1117 = vmatprep.subr.bf16.mxu0 %v2252_v19  ;;  %v2322_v19 = vld [vmem:[#allocation2 + $0x4c0] ss:$8 sps:$4 sm:$0xff]  }
 0x1ed   :  { %1118 = vmatpush1.bf16.msra.mxu0 %v2250_v20  ;;  %v2327_v20 = vld [vmem:[#allocation2 + $0x4d4] ss:$8 sps:$4 sm:$0xff]  }
 0x1ee   :  { %1119 = vmatprep.subr.bf16.mxu0 %v2255_v21  ;;  %v2325_v21 = vld [vmem:[#allocation2 + $0x4d0] ss:$8 sps:$4 sm:$0xff]  }
 0x1f1   :  { %1120 = vmatpush1.bf16.msra.mxu0 %v2253_v22  ;;  %v153_v22 = vld [vmem:[%s2636_s4 + $0x4] sm:$0x3] }
 0x1f2   :  { %1121 = vmatprep.subr.bf16.mxu0 %v2258_v23  ;;  %v853_v23 = vrot.slane %v153_v22, %v2530_v9 }
 0x1f5   :  { %1122 = vmatpush1.bf16.msra.mxu0 %v2256_v24  ;;  %v857_v24 = vrot.slane %v153_v22, %v2535_v11  ;;  %v2382_v22 = vld [vmem:[%s2637_s5 + $0x40] sm:$0xff]  }
 0x1f6   :  { %1123 = vmatprep.subr.bf16.mxu0 %v2261_v25 }
 0x1f9   :  { %1124 = vmatpush1.bf16.msra.mxu0 %v2259_v26 }
 0x1fa   :  { %1125 = vmatprep.subr.bf16.mxu0 %v2264_v27 }
 0x1fd   :  { %1126 = vmatpush1.bf16.msra.mxu0 %v2262_v28 }
 0x1fe   :  { %1127 = vmatprep.subr.bf16.mxu0 %v2267_v29 }
 0x201   :  { %1128 = vmatpush1.bf16.msra.mxu0 %v2265_v30 }
 0x202   :  { %1129 = vmatprep.subr.bf16.mxu0 %v2270_v31 }
 0x205   :  { %1130 = vmatpush1.bf16.msra.mxu0 %v2268_v32 }
 0x206   :  { %1131 = vmatprep.subr.bf16.mxu0 %v2273_v33 }
 0x209   :  { %1132 = vmatpush1.bf16.msra.mxu0 %v2271_v34 }
 0x20a   :  { %1133 = vmatprep.subr.bf16.mxu0 %v2276_v35  ;;  %v2330_v35 = vld [vmem:[#allocation2 + $0x4e4] ss:$8 sps:$4 sm:$0xff]  }
 0x20d   :  { %1134 = vmatpush1.bf16.msra.mxu0 %v2274_v36  ;;  %v2328_v36 = vld [vmem:[#allocation2 + $0x4e0] ss:$8 sps:$4 sm:$0xff]  }
 0x20e   :  { %1135 = vmatprep.subr.bf16.mxu0 %v2279_v37  ;;  %v2333_v37 = vld [vmem:[#allocation2 + $0x4f4] ss:$8 sps:$4 sm:$0xff]  }
 0x211   :  { %1136 = vmatpush1.bf16.msra.mxu0 %v2277_v38  ;;  %v2331_v38 = vld [vmem:[#allocation2 + $0x4f0] ss:$8 sps:$4 sm:$0xff]  }
 0x212   :  { %1137 = vmatprep.subr.bf16.mxu0 %v2282_v52  ;;  %v2352_v52 = vld [vmem:[#allocation2 + $0x560] ss:$8 sps:$4 sm:$0xff]  }
 0x215   :  { %1138 = vmatpush1.bf16.msra.mxu0 %v2280_v53  ;;  %v2357_v53 = vld [vmem:[#allocation2 + $0x574] ss:$8 sps:$4 sm:$0xff]  }
 0x216   :  { %1139 = vmatprep.subr.bf16.mxu0 %v2285_v54  ;;  %v2355_v54 = vld [vmem:[#allocation2 + $0x570] ss:$8 sps:$4 sm:$0xff]  }
 0x219   :  { %1140 = vmatpush1.bf16.msra.mxu0 %v2283_v55  ;;  %v2360_v55 = vld [vmem:[#allocation2 + $0x584] ss:$8 sps:$4 sm:$0xff]  }
 0x2af   :  { %v645_v42 = vpop.f32.mrb[4].mxu0 }
 0x2b0   :  { %v646_v43 = vadd.f32 %v645_v42, %v604_v40  ;;  %v647_v44 = vpop.f32.mrb[5].mxu0  ;;  %v2336_v40 = vld [vmem:[#allocation2 + $0x504] ss:$8 sps:$4 sm:$0xff]   ;;  %v2337_v42 = vld [vmem:[#allocation2 + $0x510] ss:$8 sps:$4 sm:$0xff]  }
 0x2b1   :  { %v648_v45 = vadd.f32 %v647_v44, %v608_v41  ;;  %v649_v46 = vpop.f32.mrb[6].mxu0  ;;  %v2339_v41 = vld [vmem:[#allocation2 + $0x514] ss:$8 sps:$4 sm:$0xff]   ;;  %1607 = vmatprep.subr.bf16.mxu0 %v2336_v40  ;;  %v2340_v44 = vld [vmem:[#allocation2 + $0x520] ss:$8 sps:$4 sm:$0xff]  }
 0x2b2   :  { %v652_v47 = vmax.f32 %v646_v43, 0.0  ;;  %v650_v48 = vpop.f32.mrb[7].mxu0  ;;  %v2342_v43 = vld [vmem:[#allocation2 + $0x524] ss:$8 sps:$4 sm:$0xff]   ;;  %v2343_v46 = vld [vmem:[#allocation2 + $0x530] ss:$8 sps:$4 sm:$0xff]  }
 0x2b3   :  { %v653_v49 = vmax.f32 %v648_v45, 0.0  ;;  %v2345_v45 = vld [vmem:[#allocation2 + $0x534] ss:$8 sps:$4 sm:$0xff]   ;;  %v2346_v48 = vld [vmem:[#allocation2 + $0x540] ss:$8 sps:$4 sm:$0xff]  }
 0x2b4   :  { %v654_v51 = vpack.c.bf16 %v652_v47, %v652_v47  ;;  %v2348_v47 = vld [vmem:[#allocation2 + $0x544] ss:$8 sps:$4 sm:$0xff]  }
 0x2b5   :  { %v655_v50 = vpack.c.bf16 %v653_v49, %v653_v49  ;;  %v2351_v49 = vld [vmem:[#allocation2 + $0x554] ss:$8 sps:$4 sm:$0xff]  }
 0x2b7   :  { %892 = vmatprep.mubr.bf16.mxu1 %v655_v50  ;;  %v2349_v50 = vld [vmem:[#allocation2 + $0x550] ss:$8 sps:$4 sm:$0xff]  }
 0x2b8   :  { %893 = vmatmul.mubr.bf16.vlgmr.msra.gmra.mrb[4].mxu1 %v654_v51  ;;  %v2354_v51 = vld [vmem:[#allocation2 + $0x564] ss:$8 sps:$4 sm:$0xff]  }
 0x2b9   :  { %1359 = vmatpush1.bf16.msra.mxu1 %v2286_v56  ;;  %v2358_v56 = vld [vmem:[#allocation2 + $0x580] ss:$8 sps:$4 sm:$0xff]  }
 0x2ba   :  { %1360 = vmatprep.subr.bf16.mxu1 %v2291_v58  ;;  %v2361_v58 = vld [vmem:[#allocation2 + $0x590] ss:$8 sps:$4 sm:$0xff]  }
 0x2bd   :  { %1361 = vmatpush1.bf16.msra.mxu1 %v2289_v59  ;;  %v2366_v59 = vld [vmem:[#allocation2 + $0x5a4] ss:$8 sps:$4 sm:$0xff]  }
 0x2be   :  { %1362 = vmatprep.subr.bf16.mxu1 %v2294_v60  ;;  %v2364_v60 = vld [vmem:[#allocation2 + $0x5a0] ss:$8 sps:$4 sm:$0xff]  }
 0x2c1   :  { %1363 = vmatpush1.bf16.msra.mxu1 %v2292_v61  ;;  %v2369_v61 = vld [vmem:[#allocation2 + $0x5b4] ss:$8 sps:$4 sm:$0xff]  }
 0x2c2   :  { %1364 = vmatprep.subr.bf16.mxu1 %v2297_v62  ;;  %v2367_v62 = vld [vmem:[#allocation2 + $0x5b0] ss:$8 sps:$4 sm:$0xff]  }
 0x2c5   :  { %1365 = vmatpush1.bf16.msra.mxu1 %v2295_v63  ;;  %v2372_v63 = vld [vmem:[#allocation2 + $0x5c4] ss:$8 sps:$4 sm:$0xff]  }
 0x2c6   :  { %1366 = vmatprep.subr.bf16.mxu1 %v2300_v0  ;;  %v2370_v0 = vld [vmem:[#allocation2 + $0x5c0] ss:$8 sps:$4 sm:$0xff]  }
 0x2c9   :  { %1367 = vmatpush1.bf16.msra.mxu1 %v2298_v1  ;;  %v2375_v1 = vld [vmem:[#allocation2 + $0x5d4] ss:$8 sps:$4 sm:$0xff]  }
 0x2ca   :  { %1368 = vmatprep.subr.bf16.mxu1 %v2303_v2  ;;  %v2373_v2 = vld [vmem:[#allocation2 + $0x5d0] ss:$8 sps:$4 sm:$0xff]  }
 0x2cd   :  { %1369 = vmatpush1.bf16.msra.mxu1 %v2301_v3  ;;  %v154_v3 = vld [vmem:[%s2636_s4 + $0x6] sm:$0x3] }
 0x2ce   :  { %1370 = vmatprep.subr.bf16.mxu1 %v2306_v4  ;;  %v1102_v4 = vrot.slane %v154_v3, %v2530_v9 }
 0x2d1   :  { %1371 = vmatpush1.bf16.msra.mxu1 %v2304_v5  ;;  %v1106_v5 = vrot.slane %v154_v3, %v2535_v11 }
 0x2d2   :  { %1372 = vmatprep.subr.bf16.mxu1 %v2309_v6 }
 0x2d5   :  { %1373 = vmatpush1.bf16.msra.mxu1 %v2307_v7 }
 0x2d6   :  { %1374 = vmatprep.subr.bf16.mxu1 %v2312_v8 }
 0x2d9   :  { %1375 = vmatpush1.bf16.msra.mxu1 %v2310_v10 }
 0x2da   :  { %1376 = vmatprep.subr.bf16.mxu1 %v2315_v12 }
 0x2dd   :  { %1377 = vmatpush1.bf16.msra.mxu1 %v2313_v13 }
 0x2de   :  { %1378 = vmatprep.subr.bf16.mxu1 %v2318_v14 }
 0x2e1   :  { %1379 = vmatpush1.bf16.msra.mxu1 %v2316_v15 }
 0x2e2   :  { %1380 = vmatprep.subr.bf16.mxu1 %v2321_v16 }
 0x2e5   :  { %1381 = vmatpush1.bf16.msra.mxu1 %v2319_v17 }
 0x2e6   :  { %1382 = vmatprep.subr.bf16.mxu1 %v2324_v18  ;;  %v2378_v18 = vld [vmem:[#allocation2 + $0x5e4] ss:$8 sps:$4 sm:$0xff]  }
 0x2e9   :  { %1383 = vmatpush1.bf16.msra.mxu1 %v2322_v19  ;;  %v2376_v19 = vld [vmem:[#allocation2 + $0x5e0] ss:$8 sps:$4 sm:$0xff]  }
 0x2ea   :  { %1384 = vmatprep.subr.bf16.mxu1 %v2327_v20  ;;  %v2381_v20 = vld [vmem:[#allocation2 + $0x5f4] ss:$8 sps:$4 sm:$0xff]  }
 0x2ed   :  { %1385 = vmatpush1.bf16.msra.mxu1 %v2325_v21  ;;  %v2379_v21 = vld [vmem:[#allocation2 + $0x5f0] ss:$8 sps:$4 sm:$0xff]  }
 0x2ee   :  { %1386 = vmatprep.subr.bf16.mxu1 %v2330_v35 }
 0x2f1   :  { %1387 = vmatpush1.bf16.msra.mxu1 %v2328_v36 }
 0x2f2   :  { %1388 = vmatprep.subr.bf16.mxu1 %v2333_v37 }
 0x2f5   :  { %1389 = vmatpush1.bf16.msra.mxu1 %v2331_v38 }
 0x2f6   :  { %2055 = vmatprep.subr.bf16.mxu1 %v2382_v22 }
 0x38b   :  { %v894_v25 = vpop.f32.mrb[4].mxu1 }
 0x38c   :  { %v895_v26 = vadd.f32 %v894_v25, %v853_v23  ;;  %v896_v27 = vpop.f32.mrb[5].mxu1  ;;  %v2383_v23 = vld [vmem:[%s2637_s5] sm:$0xff]   ;;  %v2385_v25 = vld [vmem:[%s2637_s5 + $0x8] sm:$0xff]  }
 0x38d   :  { %v897_v28 = vadd.f32 %v896_v27, %v857_v24  ;;  %v898_v29 = vpop.f32.mrb[6].mxu1  ;;  %v2384_v24 = vld [vmem:[%s2637_s5 + $0x48] sm:$0xff]   ;;  %v2387_v27 = vld [vmem:[%s2637_s5 + $0x10] sm:$0xff]  }
 0x38e   :  { %v901_v30 = vmax.f32 %v895_v26, 0.0  ;;  %v899_v31 = vpop.f32.mrb[7].mxu1  ;;  %v2386_v26 = vld [vmem:[%s2637_s5 + $0x50] sm:$0xff]   ;;  %v2389_v29 = vld [vmem:[%s2637_s5 + $0x18] sm:$0xff]  }
 0x38f   :  { %v902_v32 = vmax.f32 %v897_v28, 0.0  ;;  %v2388_v28 = vld [vmem:[%s2637_s5 + $0x58] sm:$0xff]   ;;  %v2391_v31 = vld [vmem:[%s2637_s5 + $0x20] sm:$0xff]  }
 0x390   :  { %v903_v34 = vpack.c.bf16 %v901_v30, %v901_v30  ;;  %v2390_v30 = vld [vmem:[%s2637_s5 + $0x60] sm:$0xff]  }
 0x391   :  { %v904_v33 = vpack.c.bf16 %v902_v32, %v902_v32  ;;  %v2392_v32 = vld [vmem:[%s2637_s5 + $0x68] sm:$0xff]  }
 0x393   :  { %1141 = vmatprep.mubr.bf16.mxu0 %v904_v33  ;;  %v2393_v33 = vld [vmem:[%s2637_s5 + $0x28] sm:$0xff]  }
 0x394   :  { %1142 = vmatmul.mubr.bf16.vlgmr.msra.gmra.mrb[8].mxu0 %v903_v34  ;;  %v155_v34 = vld [vmem:[%s2636_s4 + $0x8] sm:$0x3] }
 0x395   :  { %1608 = vmatpush1.bf16.msra.mxu0 %v2334_v39  ;;  %v1351_v35 = vrot.slane %v155_v34, %v2530_v9  ;;  %v1355_v36 = vrot.slane %v155_v34, %v2535_v11 }
 0x396   :  { %1609 = vmatprep.subr.bf16.mxu0 %v2339_v41 }
 0x399   :  { %1610 = vmatpush1.bf16.msra.mxu0 %v2337_v42 }
 0x39a   :  { %1611 = vmatprep.subr.bf16.mxu0 %v2342_v43 }
 0x39d   :  { %1612 = vmatpush1.bf16.msra.mxu0 %v2340_v44 }
 0x39e   :  { %1613 = vmatprep.subr.bf16.mxu0 %v2345_v45 }
 0x3a1   :  { %1614 = vmatpush1.bf16.msra.mxu0 %v2343_v46 }
 0x3a2   :  { %1615 = vmatprep.subr.bf16.mxu0 %v2348_v47  ;;  %v2394_v47 = vld [vmem:[%s2637_s5 + $0x70] sm:$0xff]  }
 0x3a5   :  { %1616 = vmatpush1.bf16.msra.mxu0 %v2346_v48  ;;  %v2395_v48 = vld [vmem:[%s2637_s5 + $0x30] sm:$0xff]  }
 0x3a6   :  { %1617 = vmatprep.subr.bf16.mxu0 %v2351_v49  ;;  %v2396_v49 = vld [vmem:[%s2637_s5 + $0x78] sm:$0xff]  }
 0x3a9   :  { %1618 = vmatpush1.bf16.msra.mxu0 %v2349_v50  ;;  %v2397_v50 = vld [vmem:[%s2637_s5 + $0x38] sm:$0xff]  }
 0x3aa   :  { %1619 = vmatprep.subr.bf16.mxu0 %v2354_v51  ;;  %v156_v51 = vld [vmem:[%s2636_s4 + $0xa] sm:$0x3]  ;;  %s2450_s4 = smov [#allocation5]  }
 0x3ab   :  { %s1829_s25 = sshll.u32 %s2450_s4, 4  ;;  %s1830_s25 = int_to_ptr.vmem [resolvable:$true] %s1829_s25 }
 0x3ac   :  { %s2420_s26 = scalar_lea.vmem %s1830_s25, 16  ;;  %s2424_s27 = scalar_lea.vmem %s1830_s25, 32 }
 0x3ad   :  { %1620 = vmatpush1.bf16.msra.mxu0 %v2352_v52  ;;  %v1600_v52 = vrot.slane %v156_v51, %v2530_v9  ;;  %p2421_p8 = scmp.ne.s32.totalorder %s1830_s25, %s2420_s26  ;;  %p2425_p9 = scmp.lt.s32.totalorder %s1830_s25, %s1830_s25 }
 0x3ae   :  { %1621 = vmatprep.subr.bf16.mxu0 %v2357_v53  ;;  %v1604_v53 = vrot.slane %v156_v51, %v2535_v11  ;;  %p2426_p10 = scmp.lt.s32.totalorder %s2424_s27, %s2420_s26 }
 0x3b0   :  { %p2427_p11 = por %p2426_p10, %p2425_p9 }
 0x3b1   :  { %1622 = vmatpush1.bf16.msra.mxu0 %v2355_v54 }
 0x3b2   :  { %1623 = vmatprep.subr.bf16.mxu0 %v2360_v55  ;;  %p2428_p12 = pnand %p2427_p11, %p2421_p8 }
 0x3b5   :  { %1624 = vmatpush1.bf16.msra.mxu0 %v2358_v56 }
 0x3b6   :  { %1625 = vmatprep.subr.bf16.mxu0 %v2363_v57 }
 0x3b9   :  { %1626 = vmatpush1.bf16.msra.mxu0 %v2361_v58 }
 0x3ba   :  { %1627 = vmatprep.subr.bf16.mxu0 %v2366_v59 }
 0x3bd   :  { %1628 = vmatpush1.bf16.msra.mxu0 %v2364_v60 }
 0x3be   :  { %1629 = vmatprep.subr.bf16.mxu0 %v2369_v61 }
 0x3c1   :  { %1630 = vmatpush1.bf16.msra.mxu0 %v2367_v62 }
 0x3c2   :  { %1631 = vmatprep.subr.bf16.mxu0 %v2372_v63 }
 0x3c5   :  { %1632 = vmatpush1.bf16.msra.mxu0 %v2370_v0 }
 0x3c6   :  { %1633 = vmatprep.subr.bf16.mxu0 %v2375_v1  ;;  %v1684_v1 = vld [vmem:[%s2638_s6] sm:$0x1] }
 0x3c9   :  { %1634 = vmatpush1.bf16.msra.mxu0 %v2373_v2 }
 0x3ca   :  { %1635 = vmatprep.subr.bf16.mxu0 %v2378_v18 }
 0x3cd   :  { %1636 = vmatpush1.bf16.msra.mxu0 %v2376_v19 }
 0x3ce   :  { %1637 = vmatprep.subr.bf16.mxu0 %v2381_v20 }
 0x3d1   :  { %1638 = vmatpush1.bf16.msra.mxu0 %v2379_v21 }
 0x467   :  { %v1143_v6 = vpop.f32.mrb[8].mxu0 }
 0x468   :  { %v1144_v7 = vadd.f32 %v1143_v6, %v1102_v4  ;;  %v1145_v8 = vpop.f32.mrb[9].mxu0 }
 0x469   :  { %v1146_v10 = vadd.f32 %v1145_v8, %v1106_v5  ;;  %v1147_v12 = vpop.f32.mrb[10].mxu0 }
 0x46a   :  { %v1150_v13 = vmax.f32 %v1144_v7, 0.0  ;;  %v1148_v14 = vpop.f32.mrb[11].mxu0 }
 0x46b   :  { %v1151_v15 = vmax.f32 %v1146_v10, 0.0 }
 0x46c   :  { %v1152_v17 = vpack.c.bf16 %v1150_v13, %v1150_v13 }
 0x46d   :  { %v1153_v16 = vpack.c.bf16 %v1151_v15, %v1151_v15 }
 0x46f   :  { %1390 = vmatprep.mubr.bf16.mxu1 %v1153_v16 }
 0x470   :  { %1391 = vmatmul.mubr.bf16.vlgmr.msra.gmra.mrb[8].mxu1 %v1152_v17 }
 0x471   :  { %2056 = vmatpush3.bf16.msra.mxu1 %v2383_v23 }
 0x472   :  { %2057 = vmatprep.subr.bf16.mxu1 %v2384_v24 }
 0x475   :  { %2058 = vmatpush3.bf16.msra.mxu1 %v2385_v25 }
 0x476   :  { %2059 = vmatprep.subr.bf16.mxu1 %v2386_v26 }
 0x479   :  { %2060 = vmatpush3.bf16.msra.mxu1 %v2387_v27 }
 0x47a   :  { %2061 = vmatprep.subr.bf16.mxu1 %v2388_v28 }
 0x47d   :  { %2062 = vmatpush3.bf16.msra.mxu1 %v2389_v29 }
 0x47e   :  { %2063 = vmatprep.subr.bf16.mxu1 %v2390_v30 }
 0x481   :  { %2064 = vmatpush3.bf16.msra.mxu1 %v2391_v31 }
 0x482   :  { %2065 = vmatprep.subr.bf16.mxu1 %v2392_v32 }
 0x485   :  { %2066 = vmatpush3.bf16.msra.mxu1 %v2393_v33 }
 0x486   :  { %2067 = vmatprep.subr.bf16.mxu1 %v2394_v47 }
 0x489   :  { %2068 = vmatpush3.bf16.msra.mxu1 %v2395_v48 }
 0x48a   :  { %2069 = vmatprep.subr.bf16.mxu1 %v2396_v49 }
 0x48d   :  { %2070 = vmatpush3.bf16.msra.mxu1 %v2397_v50 }
 0x543   :  { %v1392_v37 = vpop.f32.mrb[8].mxu1 }
 0x544   :  { %v1393_v38 = vadd.f32 %v1392_v37, %v1351_v35  ;;  %v1394_v39 = vpop.f32.mrb[9].mxu1 }
 0x545   :  { %v1395_v40 = vadd.f32 %v1394_v39, %v1355_v36  ;;  %v1396_v41 = vpop.f32.mrb[10].mxu1 }
 0x546   :  { %v1399_v42 = vmax.f32 %v1393_v38, 0.0  ;;  %v1397_v43 = vpop.f32.mrb[11].mxu1 }
 0x547   :  { %v1400_v44 = vmax.f32 %v1395_v40, 0.0 }
 0x548   :  { %v1401_v46 = vpack.c.bf16 %v1399_v42, %v1399_v42 }
 0x549   :  { %v1402_v45 = vpack.c.bf16 %v1400_v44, %v1400_v44 }
 0x54b   :  { %1639 = vmatprep.mubr.bf16.mxu0 %v1402_v45 }
 0x54c   :  { %1640 = vmatmul.mubr.bf16.vlgmr.msra.gmra.mrb[12].mxu0 %v1401_v46 }
 0x61f   :  { %v1641_v54 = vpop.f32.mrb[12].mxu0 }
 0x620   :  { %v1642_v55 = vadd.f32 %v1641_v54, %v1600_v52  ;;  %v1643_v56 = vpop.f32.mrb[13].mxu0 }
 0x621   :  { %v1644_v57 = vadd.f32 %v1643_v56, %v1604_v53  ;;  %v1645_v58 = vpop.f32.mrb[14].mxu0 }
 0x622   :  { %v1648_v59 = vmax.f32 %v1642_v55, 0.0  ;;  %v1646_v60 = vpop.f32.mrb[15].mxu0 }
 0x623   :  { %v1649_v61 = vmax.f32 %v1644_v57, 0.0 }
 0x624   :  { %v1650_v63 = vpack.c.bf16 %v1648_v59, %v1648_v59 }
 0x625   :  { %v1651_v62 = vpack.c.bf16 %v1649_v61, %v1649_v61 }
 0x627   :  { %1813 = vmatprep.mubr.bf16.mxu1 %v1651_v62 }
 0x628   :  { %1814 = vmatmul.mubr.bf16.vlgmr.msra.gmra.mrb[12].mxu1 %v1650_v63 }
 0x6fb   :  { %v2071_v0 = vpop.f32.mrb[12].mxu1 }
 0x6fc   :  { %v2072_v9 = vpop.f32.mrb[13].mxu1 }
 0x6fd   :  { %v2073_v11 = vadd.f32 %v2072_v9, %v2071_v0  ;;  %v2074_v2 = vpop.f32.mrb[14].mxu1 }
 0x6fe   :  { %v2075_v3 = vpop.f32.mrb[15].mxu1 }
 0x6ff   :  { %v1816_v4 = vadd.f32 %v2073_v11, %v1684_v1 }
 0x701   :  { %1822 = vst.msk [vmem:[#allocation5] sm:$0x1] %vm1821_vm1, %v1816_v4 }
 0x702   :  { %2431 = shalt.err (!%p2428_p12)
}
 0x703   :  { %s2432_s29 = scalar_lea.hbm %s2639_s7, 16 }
 0x704   :  { %p2433_p13 = scmp.ne.s32.totalorder %s2639_s7, %s2432_s29  ;;  %p2436_p0 = scmp.lt.u32.totalorder %s2432_s29, %s2639_s7 }
 0x706   :  { %p2438_p1 = pnand %p2436_p0, %p2433_p13 }
 0x708   :  { %2441 = shalt.err (!%p2438_p1)
}
 0x709   :  { %1832 = dma.vmem_to_hbm [thread:$0]  %s1830_s25, 16, %s2639_s7, [#allocation4]  }
 0x70a   :  { %2444 = dma.done.wait [#allocation4], 16  }
 0x70b   :  { %2445 = vsyncadd [#allocation4], 4294967280 }
 0x70c   :  { %1836 = vsyncpa [#allocation3], 1 }
 0x70d   :  { %1837 = vsyncpa [#allocation4], 1 }

</bundles_post_ra>
